<compile_context>
chip_gen: v6e
topology: v6e:2x2x1
jax: 0.10.0
libtpu: 0.0.40
codegen_flags: <defaults>
</compile_context>

<pallas_src>
import jax
import jax.numpy as jnp
from jax.experimental import pallas as pl
from jax.experimental.pallas import tpu as pltpu


def _round_up(x, m):
    return (x + m - 1) // m * m


def _make_kernel(in_pad, opp_size, half, bet_lane, with_opp):
    """Kernel specialized on layout constants and on the opponent branch."""

    def kernel(*refs):
        if with_opp:
            (xo_ref,
             w1, b1, w2, b2,
             wo, bo,
             wc1a, wc1b, bc1,
             wc2, bc2,
             wh, bh, ws2r, bs2,
             out_ref) = refs
        else:
            (xo_ref,
             w1, b1, w2, b2,
             wc1a, bc1,
             wc2, bc2,
             wh, bh, ws2r, bs2,
             out_ref) = refs

        f32, bf16 = jnp.float32, jnp.bfloat16

        # base_state: Linear -> Tanh -> Linear -> Tanh
        x = xo_ref[:, :in_pad]                       # bf16, lane-0 aligned
        h = jnp.tanh(jnp.dot(x, w1[...], preferred_element_type=f32) + b1[...])
        h = jnp.tanh(jnp.dot(h.astype(bf16), w2[...],
                             preferred_element_type=f32) + b2[...])

        # combined[0]: Linear(concat([h, opp_enc])) as a split matmul.
        pre = jnp.dot(h.astype(bf16), wc1a[...],
                      preferred_element_type=f32) + bc1[...]
        if with_opp:
            opp = xo_ref[:, in_pad:in_pad + opp_size]   # starts at 128-aligned lane
            enc = jnp.maximum(
                jnp.dot(opp, wo[...], preferred_element_type=f32) + bo[...], 0.0)
            pre = pre + jnp.dot(enc.astype(bf16), wc1b[...],
                                preferred_element_type=f32)
        # (no-opponent path: zeros @ wc1b == 0, dropped entirely)
        c = jnp.tanh(pre)
        c = jnp.tanh(jnp.dot(c.astype(bf16), wc2[...],
                             preferred_element_type=f32) + bc2[...])

        # Fused heads, lane-0 layout:
        #   lanes [0 : half)            -> sizing-head hidden (pre-tanh)
        #   lanes [half : half+na)      -> action logits
        #   lane  half+na               -> (zero, later overwritten by bet)
        heads = jnp.dot(c.astype(bf16), wh[...],
                        preferred_element_type=f32) + bh[...]
        s = jnp.tanh(heads[:, :half])                 # offset-0 slice: free

        # Sizing head second layer: N=1, so VPU multiply + XLU lane reduction
        # instead of an MXU push/drain for a single output lane.
        bet_pre = jnp.sum(s * ws2r[...], axis=-1, keepdims=True) + bs2[...]
        bet = 0.1 + 2.9 * jax.nn.sigmoid(bet_pre)

        # Splice bet into its lane, one full lane-dense store.
        lane = jax.lax.broadcasted_iota(jnp.int32, heads.shape, 1)
        out_ref[...] = jnp.where(lane == bet_lane, bet, heads)

    return kernel


def init_params(key, input_size, opponent_feature_size, hidden_size, num_actions):
    """Deterministic PyTorch-style (uniform +-1/sqrt(fan_in)) initialization."""
    def linear(k, fan_in, fan_out):
        k1, k2 = jax.random.split(k)
        bound = 1.0 / float(fan_in) ** 0.5
        w = jax.random.uniform(k1, (fan_in, fan_out), jnp.float32, -bound, bound)
        b = jax.random.uniform(k2, (1, fan_out), jnp.float32, -bound, bound)
        return w, b

    keys = jax.random.split(key, 8)
    half = hidden_size // 2
    p = {}
    p['w1'], p['b1'] = linear(keys[0], input_size, hidden_size)
    p['w2'], p['b2'] = linear(keys[1], hidden_size, hidden_size)
    p['wo'], p['bo'] = linear(keys[2], opponent_feature_size, half)
    wc1, p['bc1'] = linear(keys[3], hidden_size + half, hidden_size)
    p['wc1a'] = wc1[:hidden_size]      # rows multiplying the base-state features
    p['wc1b'] = wc1[hidden_size:]      # rows multiplying the opponent encoding
    p['wc2'], p['bc2'] = linear(keys[4], hidden_size, hidden_size)
    p['wa'], p['ba'] = linear(keys[5], hidden_size, num_actions)
    p['ws1'], p['bs1'] = linear(keys[6], hidden_size, half)
    p['ws2'], p['bs2'] = linear(keys[7], half, 1)
    return p


def prepare_params(params):
    """One-time packing / padding / casting of weights (hoisted out of forward)."""
    bf16 = jnp.bfloat16
    input_size, hidden = params['w1'].shape
    half = params['ws1'].shape[1]
    num_actions = params['wa'].shape[1]
    opp_size = params['wo'].shape[0]

    in_pad = _round_up(input_size, 128)               # keep x @ w1 lane-aligned
    out_pad = _round_up(half + num_actions + 1, 128)  # fused head slab width
    bet_lane = half + num_actions

    # w1 padded with zero rows so the (padded) x tile can be used directly.
    w1p = jnp.zeros((in_pad, hidden), jnp.float32).at[:input_size].set(params['w1'])

    # Fused heads, sizing columns first (lane-0 aligned slice in the kernel).
    # Invariant: column `bet_lane` of wh and bh stays exactly zero (bet splice).
    wh = jnp.zeros((hidden, out_pad), jnp.float32)
    wh = wh.at[:, :half].set(params['ws1'])
    wh = wh.at[:, half:half + num_actions].set(params['wa'])
    bh = jnp.zeros((1, out_pad), jnp.float32)
    bh = bh.at[:, :half].set(params['bs1'])
    bh = bh.at[:, half:half + num_actions].set(params['ba'])

    arrays = dict(
        # MXU operands in bf16, biases (added to f32 accumulators) in f32.
        w1=w1p.astype(bf16), b1=params['b1'],
        w2=params['w2'].astype(bf16), b2=params['b2'],
        wo=params['wo'].astype(bf16), bo=params['bo'],
        wc1a=params['wc1a'].astype(bf16), wc1b=params['wc1b'].astype(bf16),
        bc1=params['bc1'],
        wc2=params['wc2'].astype(bf16), bc2=params['bc2'],
        wh=wh.astype(bf16), bh=bh,
        ws2_row=params['ws2'].T,     # (1, half) f32: VPU operand (v5e-safe)
        bs2=params['bs2'],           # (1, 1)    f32
    )
    meta = dict(input_size=input_size, in_pad=in_pad, opp_size=opp_size,
                hidden=hidden, half=half, num_actions=num_actions,
                out_pad=out_pad, bet_lane=bet_lane)
    return {'arrays': arrays, 'meta': meta}


def enhanced_poker_forward(prepared, state_input, opponent_features=None, *,
                           batch_tile_cap=1024):
    meta, arrs = prepared['meta'], prepared['arrays']
    input_size, in_pad = meta['input_size'], meta['in_pad']
    opp_size, half = meta['opp_size'], meta['half']
    num_actions, out_pad = meta['num_actions'], meta['out_pad']
    bet_lane = meta['bet_lane']

    batch = state_input.shape[0]
    x = state_input.astype(jnp.bfloat16)
    if in_pad != input_size:
        x = jnp.pad(x, ((0, 0), (0, in_pad - input_size)))

    with_opp = opponent_features is not None
    if with_opp:
        # One lane-dense input stream; opp starts at a 128-aligned lane.
        xo = jnp.concatenate([x, opponent_features.astype(jnp.bfloat16)], axis=1)
    else:
        xo = x

    # Batch tiling: always >= 2 grid steps (v7x dual-TC split of the
    # "parallel" axis), tile <= batch_tile_cap, padding waste <= steps*8 rows.
    b8 = _round_up(max(batch, 1), 8)
    steps = max(2, pl.cdiv(b8, batch_tile_cap))
    tb = _round_up(pl.cdiv(b8, steps), 8)
    b_pad = steps * tb
    if b_pad != batch:
        xo = jnp.pad(xo, ((0, b_pad - batch), (0, 0)))

    if with_opp:
        names = ('w1', 'b1', 'w2', 'b2', 'wo', 'bo', 'wc1a', 'wc1b', 'bc1',
                 'wc2', 'bc2', 'wh', 'bh', 'ws2_row', 'bs2')
    else:
        names = ('w1', 'b1', 'w2', 'b2', 'wc1a', 'bc1',
                 'wc2', 'bc2', 'wh', 'bh', 'ws2_row', 'bs2')
    weights = [arrs[n] for n in names]

    kernel = _make_kernel(in_pad, opp_size, half, bet_lane, with_opp)

    xo_spec = pl.BlockSpec((tb, xo.shape[1]), lambda i: (i, 0))
    # Constant index_map -> weights resident in VMEM, fetched once.
    w_specs = [pl.BlockSpec(w.shape, lambda i: (0, 0)) for w in weights]

    out = pl.pallas_call(
        kernel,
        grid=(steps,),
        out_shape=jax.ShapeDtypeStruct((b_pad, out_pad), jnp.float32),
        in_specs=[xo_spec] + w_specs,
        out_specs=pl.BlockSpec((tb, out_pad), lambda i: (i, 0)),
        compiler_params=pltpu.CompilerParams(dimension_semantics=("parallel",)),
    )(xo, *weights)

    logits = out[:batch, half:half + num_actions]
    bet = out[:batch, bet_lane:bet_lane + 1]
    return logits, bet


def _reference_forward(params, x, opp=None):
    """Pure-JAX f32 reference mirroring the PyTorch forward."""
    h = jnp.tanh(x @ params['w1'] + params['b1'])
    h = jnp.tanh(h @ params['w2'] + params['b2'])
    if opp is not None:
        enc = jax.nn.relu(opp @ params['wo'] + params['bo'])
    else:
        enc = jnp.zeros((x.shape[0], params['wo'].shape[1]), jnp.float32)
    c = jnp.tanh(h @ params['wc1a'] + enc @ params['wc1b'] + params['bc1'])
    c = jnp.tanh(c @ params['wc2'] + params['bc2'])
    logits = c @ params['wa'] + params['ba']
    s = jnp.tanh(c @ params['ws1'] + params['bs1'])
    bet = 0.1 + 2.9 * jax.nn.sigmoid(s @ params['ws2'] + params['bs2'])
    return logits, bet


if __name__ == "__main__":
    # Small shapes consistent with the module's interface
    # (input_size, opponent_feature_size, hidden_size, num_actions).
    # BATCH=10 is deliberately not a multiple of 8 to exercise wrapper padding
    # and the >=2-step batch grid.
    INPUT_SIZE, OPP_SIZE, HIDDEN, NUM_ACTIONS, BATCH = 128, 32, 64, 3, 10

    key = jax.random.PRNGKey(0)
    k_params, k_x, k_opp = jax.random.split(key, 3)

    params = init_params(k_params, INPUT_SIZE, OPP_SIZE, HIDDEN, NUM_ACTIONS)
    prepared = prepare_params(params)            # one-time packing/casting
    state_input = jax.random.normal(k_x, (BATCH, INPUT_SIZE), jnp.float32)
    opponent_features = jax.random.normal(k_opp, (BATCH, OPP_SIZE), jnp.float32)

    # Tolerance: kernel uses bf16 MXU operands (f32 accumulation / elementwise);
    # the f32 jnp reference itself uses TPU-default (bf16-pass) matmuls, so the
    # two agree to ~1e-2.  Use precision=HIGHEST in the dots if exact f32 is needed.
    ATOL = 5e-2

    # Path 1: with opponent features
    logits, bet = enhanced_poker_forward(prepared, state_input, opponent_features)
    jax.block_until_ready((logits, bet))
    ref_logits, ref_bet = _reference_forward(params, state_input, opponent_features)
    assert jnp.allclose(logits, ref_logits, atol=ATOL, rtol=0.0)
    assert jnp.allclose(bet, ref_bet, atol=ATOL, rtol=0.0)

    # Path 2: opponent_features is None (torch concatenates zeros)
    logits0, bet0 = enhanced_poker_forward(prepared, state_input, None)
    jax.block_until_ready((logits0, bet0))
    ref_logits0, ref_bet0 = _reference_forward(params, state_input, None)
    assert jnp.allclose(logits0, ref_logits0, atol=ATOL, rtol=0.0)
    assert jnp.allclose(bet0, ref_bet0, atol=ATOL, rtol=0.0)

    assert logits.shape == (BATCH, NUM_ACTIONS) and bet.shape == (BATCH, 1)
    assert logits0.shape == (BATCH, NUM_ACTIONS) and bet0.shape == (BATCH, 1)
    print("KERNEL_OK")
</pallas_src>

<mosaic_0001>
module attributes {stable_mosaic.version = 11 : i64} {
  func.func @kernel(%arg0: i32, %arg1: memref<8x160xbf16, #tpu.memory_space<vmem>>, %arg2: memref<128x64xbf16, #tpu.memory_space<vmem>>, %arg3: memref<1x64xf32, #tpu.memory_space<vmem>>, %arg4: memref<64x64xbf16, #tpu.memory_space<vmem>>, %arg5: memref<1x64xf32, #tpu.memory_space<vmem>>, %arg6: memref<32x32xbf16, #tpu.memory_space<vmem>>, %arg7: memref<1x32xf32, #tpu.memory_space<vmem>>, %arg8: memref<64x64xbf16, #tpu.memory_space<vmem>>, %arg9: memref<32x64xbf16, #tpu.memory_space<vmem>>, %arg10: memref<1x64xf32, #tpu.memory_space<vmem>>, %arg11: memref<64x64xbf16, #tpu.memory_space<vmem>>, %arg12: memref<1x64xf32, #tpu.memory_space<vmem>>, %arg13: memref<64x128xbf16, #tpu.memory_space<vmem>>, %arg14: memref<1x128xf32, #tpu.memory_space<vmem>>, %arg15: memref<1x32xf32, #tpu.memory_space<vmem>>, %arg16: memref<1x1xf32, #tpu.memory_space<vmem>>, %arg17: memref<8x128xf32, #tpu.memory_space<vmem>>) attributes {dimension_semantics = [#tpu.dimension_semantics<parallel>], iteration_bounds = array<i64: 2>, scalar_prefetch = 0 : i64, scratch_operands = 0 : i64, tpu.core_type = #tpu.core_type<tc>, window_params = [{transform_indices = @transform_0, window_bounds = array<i64: 8, 160>}, {pipeline_mode = #tpu.pipeline_mode<synchronous>, transform_indices = @transform_1, window_bounds = array<i64: 128, 64>}, {pipeline_mode = #tpu.pipeline_mode<synchronous>, transform_indices = @transform_2, window_bounds = array<i64: 1, 64>}, {pipeline_mode = #tpu.pipeline_mode<synchronous>, transform_indices = @transform_3, window_bounds = array<i64: 64, 64>}, {pipeline_mode = #tpu.pipeline_mode<synchronous>, transform_indices = @transform_4, window_bounds = array<i64: 1, 64>}, {pipeline_mode = #tpu.pipeline_mode<synchronous>, transform_indices = @transform_5, window_bounds = array<i64: 32, 32>}, {pipeline_mode = #tpu.pipeline_mode<synchronous>, transform_indices = @transform_6, window_bounds = array<i64: 1, 32>}, {pipeline_mode = #tpu.pipeline_mode<synchronous>, transform_indices = @transform_7, window_bounds = array<i64: 64, 64>}, {pipeline_mode = #tpu.pipeline_mode<synchronous>, transform_indices = @transform_8, window_bounds = array<i64: 32, 64>}, {pipeline_mode = #tpu.pipeline_mode<synchronous>, transform_indices = @transform_9, window_bounds = array<i64: 1, 64>}, {pipeline_mode = #tpu.pipeline_mode<synchronous>, transform_indices = @transform_10, window_bounds = array<i64: 64, 64>}, {pipeline_mode = #tpu.pipeline_mode<synchronous>, transform_indices = @transform_11, window_bounds = array<i64: 1, 64>}, {pipeline_mode = #tpu.pipeline_mode<synchronous>, transform_indices = @transform_12, window_bounds = array<i64: 64, 128>}, {pipeline_mode = #tpu.pipeline_mode<synchronous>, transform_indices = @transform_13, window_bounds = array<i64: 1, 128>}, {pipeline_mode = #tpu.pipeline_mode<synchronous>, transform_indices = @transform_14, window_bounds = array<i64: 1, 32>}, {pipeline_mode = #tpu.pipeline_mode<synchronous>, transform_indices = @transform_15, window_bounds = array<i64: 1, 1>}, {transform_indices = @transform_16, window_bounds = array<i64: 8, 128>}]} {
    %c0 = arith.constant 0 : index
    %c0_0 = arith.constant 0 : index
    %0 = vector.load %arg1[%c0, %c0_0] : memref<8x160xbf16, #tpu.memory_space<vmem>>, vector<8x128xbf16>
    %c0_1 = arith.constant 0 : index
    %c0_2 = arith.constant 0 : index
    %1 = vector.load %arg2[%c0_1, %c0_2] : memref<128x64xbf16, #tpu.memory_space<vmem>>, vector<128x64xbf16>
    %cst = arith.constant dense<0.000000e+00> : vector<8x64xf32>
    %2 = tpu.matmul %0, %1, %cst {dimension_numbers = #tpu.dot_dimension_numbers<[1], [0], [0], [1], [0, 0, 1, 1], [], []>} : vector<8x128xbf16>, vector<128x64xbf16>, vector<8x64xf32> -> vector<8x64xf32>
    %c0_3 = arith.constant 0 : index
    %c0_4 = arith.constant 0 : index
    %3 = vector.load %arg3[%c0_3, %c0_4] : memref<1x64xf32, #tpu.memory_space<vmem>>, vector<1x64xf32>
    %4 = vector.broadcast %3 : vector<1x64xf32> to vector<8x64xf32>
    %5 = arith.addf %2, %4 : vector<8x64xf32>
    %6 = math.tanh %5 : vector<8x64xf32>
    %7 = arith.truncf %6 : vector<8x64xf32> to vector<8x64xbf16>
    %c0_5 = arith.constant 0 : index
    %c0_6 = arith.constant 0 : index
    %8 = vector.load %arg4[%c0_5, %c0_6] : memref<64x64xbf16, #tpu.memory_space<vmem>>, vector<64x64xbf16>
    %cst_7 = arith.constant dense<0.000000e+00> : vector<8x64xf32>
    %9 = tpu.matmul %7, %8, %cst_7 {dimension_numbers = #tpu.dot_dimension_numbers<[1], [0], [0], [1], [0, 0, 1, 1], [], []>} : vector<8x64xbf16>, vector<64x64xbf16>, vector<8x64xf32> -> vector<8x64xf32>
    %c0_8 = arith.constant 0 : index
    %c0_9 = arith.constant 0 : index
    %10 = vector.load %arg5[%c0_8, %c0_9] : memref<1x64xf32, #tpu.memory_space<vmem>>, vector<1x64xf32>
    %11 = vector.broadcast %10 : vector<1x64xf32> to vector<8x64xf32>
    %12 = arith.addf %9, %11 : vector<8x64xf32>
    %13 = math.tanh %12 : vector<8x64xf32>
    %14 = arith.truncf %13 : vector<8x64xf32> to vector<8x64xbf16>
    %c0_10 = arith.constant 0 : index
    %c0_11 = arith.constant 0 : index
    %15 = vector.load %arg8[%c0_10, %c0_11] : memref<64x64xbf16, #tpu.memory_space<vmem>>, vector<64x64xbf16>
    %cst_12 = arith.constant dense<0.000000e+00> : vector<8x64xf32>
    %16 = tpu.matmul %14, %15, %cst_12 {dimension_numbers = #tpu.dot_dimension_numbers<[1], [0], [0], [1], [0, 0, 1, 1], [], []>} : vector<8x64xbf16>, vector<64x64xbf16>, vector<8x64xf32> -> vector<8x64xf32>
    %c0_13 = arith.constant 0 : index
    %c0_14 = arith.constant 0 : index
    %17 = vector.load %arg10[%c0_13, %c0_14] : memref<1x64xf32, #tpu.memory_space<vmem>>, vector<1x64xf32>
    %18 = vector.broadcast %17 : vector<1x64xf32> to vector<8x64xf32>
    %19 = arith.addf %16, %18 : vector<8x64xf32>
    %c0_15 = arith.constant 0 : index
    %c128 = arith.constant 128 : index
    %20 = vector.load %arg1[%c0_15, %c128] : memref<8x160xbf16, #tpu.memory_space<vmem>>, vector<8x32xbf16>
    %c0_16 = arith.constant 0 : index
    %c0_17 = arith.constant 0 : index
    %21 = vector.load %arg6[%c0_16, %c0_17] : memref<32x32xbf16, #tpu.memory_space<vmem>>, vector<32x32xbf16>
    %cst_18 = arith.constant dense<0.000000e+00> : vector<8x32xf32>
    %22 = tpu.matmul %20, %21, %cst_18 {dimension_numbers = #tpu.dot_dimension_numbers<[1], [0], [0], [1], [0, 0, 1, 1], [], []>} : vector<8x32xbf16>, vector<32x32xbf16>, vector<8x32xf32> -> vector<8x32xf32>
    %c0_19 = arith.constant 0 : index
    %c0_20 = arith.constant 0 : index
    %23 = vector.load %arg7[%c0_19, %c0_20] : memref<1x32xf32, #tpu.memory_space<vmem>>, vector<1x32xf32>
    %24 = vector.broadcast %23 : vector<1x32xf32> to vector<8x32xf32>
    %25 = arith.addf %22, %24 : vector<8x32xf32>
    %cst_21 = arith.constant 0.000000e+00 : f32
    %26 = vector.broadcast %cst_21 : f32 to vector<8x32xf32>
    %27 = arith.maximumf %25, %26 : vector<8x32xf32>
    %28 = arith.truncf %27 : vector<8x32xf32> to vector<8x32xbf16>
    %c0_22 = arith.constant 0 : index
    %c0_23 = arith.constant 0 : index
    %29 = vector.load %arg9[%c0_22, %c0_23] : memref<32x64xbf16, #tpu.memory_space<vmem>>, vector<32x64xbf16>
    %cst_24 = arith.constant dense<0.000000e+00> : vector<8x64xf32>
    %30 = tpu.matmul %28, %29, %cst_24 {dimension_numbers = #tpu.dot_dimension_numbers<[1], [0], [0], [1], [0, 0, 1, 1], [], []>} : vector<8x32xbf16>, vector<32x64xbf16>, vector<8x64xf32> -> vector<8x64xf32>
    %31 = arith.addf %19, %30 : vector<8x64xf32>
    %32 = math.tanh %31 : vector<8x64xf32>
    %33 = arith.truncf %32 : vector<8x64xf32> to vector<8x64xbf16>
    %c0_25 = arith.constant 0 : index
    %c0_26 = arith.constant 0 : index
    %34 = vector.load %arg11[%c0_25, %c0_26] : memref<64x64xbf16, #tpu.memory_space<vmem>>, vector<64x64xbf16>
    %cst_27 = arith.constant dense<0.000000e+00> : vector<8x64xf32>
    %35 = tpu.matmul %33, %34, %cst_27 {dimension_numbers = #tpu.dot_dimension_numbers<[1], [0], [0], [1], [0, 0, 1, 1], [], []>} : vector<8x64xbf16>, vector<64x64xbf16>, vector<8x64xf32> -> vector<8x64xf32>
    %c0_28 = arith.constant 0 : index
    %c0_29 = arith.constant 0 : index
    %36 = vector.load %arg12[%c0_28, %c0_29] : memref<1x64xf32, #tpu.memory_space<vmem>>, vector<1x64xf32>
    %37 = vector.broadcast %36 : vector<1x64xf32> to vector<8x64xf32>
    %38 = arith.addf %35, %37 : vector<8x64xf32>
    %39 = math.tanh %38 : vector<8x64xf32>
    %40 = arith.truncf %39 : vector<8x64xf32> to vector<8x64xbf16>
    %c0_30 = arith.constant 0 : index
    %c0_31 = arith.constant 0 : index
    %41 = vector.load %arg13[%c0_30, %c0_31] : memref<64x128xbf16, #tpu.memory_space<vmem>>, vector<64x128xbf16>
    %cst_32 = arith.constant dense<0.000000e+00> : vector<8x128xf32>
    %42 = tpu.matmul %40, %41, %cst_32 {dimension_numbers = #tpu.dot_dimension_numbers<[1], [0], [0], [1], [0, 0, 1, 1], [], []>} : vector<8x64xbf16>, vector<64x128xbf16>, vector<8x128xf32> -> vector<8x128xf32>
    %c0_33 = arith.constant 0 : index
    %c0_34 = arith.constant 0 : index
    %43 = vector.load %arg14[%c0_33, %c0_34] : memref<1x128xf32, #tpu.memory_space<vmem>>, vector<1x128xf32>
    %44 = vector.broadcast %43 : vector<1x128xf32> to vector<8x128xf32>
    %45 = arith.addf %42, %44 : vector<8x128xf32>
    %46 = vector.extract_strided_slice %45 {offsets = [0, 0], sizes = [8, 32], strides = [1, 1]} : vector<8x128xf32> to vector<8x32xf32>
    %47 = math.tanh %46 : vector<8x32xf32>
    %c0_35 = arith.constant 0 : index
    %c0_36 = arith.constant 0 : index
    %48 = vector.load %arg15[%c0_35, %c0_36] : memref<1x32xf32, #tpu.memory_space<vmem>>, vector<1x32xf32>
    %49 = vector.broadcast %48 : vector<1x32xf32> to vector<8x32xf32>
    %50 = arith.mulf %47, %49 : vector<8x32xf32>
    %cst_37 = arith.constant dense<0.000000e+00> : vector<8xf32>
    %51 = vector.multi_reduction <add>, %50, %cst_37 [1] : vector<8x32xf32> to vector<8xf32>
    %52 = vector.shape_cast %51 : vector<8xf32> to vector<8x1xf32>
    %c0_38 = arith.constant 0 : index
    %c0_39 = arith.constant 0 : index
    %53 = vector.load %arg16[%c0_38, %c0_39] : memref<1x1xf32, #tpu.memory_space<vmem>>, vector<1x1xf32>
    %54 = vector.broadcast %53 : vector<1x1xf32> to vector<8x1xf32>
    %55 = arith.addf %52, %54 : vector<8x1xf32>
    %56 = arith.negf %55 : vector<8x1xf32>
    %57 = math.exp %56 : vector<8x1xf32>
    %cst_40 = arith.constant 1.000000e+00 : f32
    %58 = vector.broadcast %cst_40 : f32 to vector<8x1xf32>
    %59 = arith.addf %58, %57 : vector<8x1xf32>
    %60 = arith.divf %58, %59 : vector<8x1xf32>
    %cst_41 = arith.constant 2.900000e+00 : f32
    %61 = vector.broadcast %cst_41 : f32 to vector<8x1xf32>
    %62 = arith.mulf %61, %60 : vector<8x1xf32>
    %cst_42 = arith.constant 1.000000e-01 : f32
    %63 = vector.broadcast %cst_42 : f32 to vector<8x1xf32>
    %64 = arith.addf %63, %62 : vector<8x1xf32>
    %65 = tpu.iota {dimensions = array<i32: 1>} : vector<8x128xi32>
    %c35_i32 = arith.constant 35 : i32
    %66 = vector.broadcast %c35_i32 : i32 to vector<8x128xi32>
    %67 = arith.cmpi eq, %65, %66 : vector<8x128xi32>
    %68 = vector.shape_cast %64 : vector<8x1xf32> to vector<8x1xf32>
    %69 = vector.broadcast %68 : vector<8x1xf32> to vector<8x128xf32>
    %70 = arith.select %67, %69, %45 : vector<8x128xi1>, vector<8x128xf32>
    %c0_43 = arith.constant 0 : index
    %c0_44 = arith.constant 0 : index
    %71 = vector.load %arg17[%c0_43, %c0_44] : memref<8x128xf32, #tpu.memory_space<vmem>>, vector<8x128xf32>
    tpu.vector_store %arg17[%c0_43, %c0_44], %70 {strides = array<i32>} : memref<8x128xf32, #tpu.memory_space<vmem>>, vector<8x128xf32>,
    return
  }
  func.func @transform_0(%arg0: i32) -> (i32, i32) {
    %c0_i32 = arith.constant 0 : i32
    %c0_i32_0 = arith.constant 0 : i32
    return %arg0, %c0_i32 : i32, i32
  }
  func.func @transform_1(%arg0: i32) -> (i32, i32) {
    %c0_i32 = arith.constant 0 : i32
    %c0_i32_0 = arith.constant 0 : i32
    %c0_i32_1 = arith.constant 0 : i32
    return %c0_i32, %c0_i32_0 : i32, i32
  }
  func.func @transform_2(%arg0: i32) -> (i32, i32) {
    %c0_i32 = arith.constant 0 : i32
    %c0_i32_0 = arith.constant 0 : i32
    %c0_i32_1 = arith.constant 0 : i32
    return %c0_i32, %c0_i32_0 : i32, i32
  }
  func.func @transform_3(%arg0: i32) -> (i32, i32) {
    %c0_i32 = arith.constant 0 : i32
    %c0_i32_0 = arith.constant 0 : i32
    %c0_i32_1 = arith.constant 0 : i32
    return %c0_i32, %c0_i32_0 : i32, i32
  }
  func.func @transform_4(%arg0: i32) -> (i32, i32) {
    %c0_i32 = arith.constant 0 : i32
    %c0_i32_0 = arith.constant 0 : i32
    %c0_i32_1 = arith.constant 0 : i32
    return %c0_i32, %c0_i32_0 : i32, i32
  }
  func.func @transform_5(%arg0: i32) -> (i32, i32) {
    %c0_i32 = arith.constant 0 : i32
    %c0_i32_0 = arith.constant 0 : i32
    %c0_i32_1 = arith.constant 0 : i32
    return %c0_i32, %c0_i32_0 : i32, i32
  }
  func.func @transform_6(%arg0: i32) -> (i32, i32) {
    %c0_i32 = arith.constant 0 : i32
    %c0_i32_0 = arith.constant 0 : i32
    %c0_i32_1 = arith.constant 0 : i32
    return %c0_i32, %c0_i32_0 : i32, i32
  }
  func.func @transform_7(%arg0: i32) -> (i32, i32) {
    %c0_i32 = arith.constant 0 : i32
    %c0_i32_0 = arith.constant 0 : i32
    %c0_i32_1 = arith.constant 0 : i32
    return %c0_i32, %c0_i32_0 : i32, i32
  }
  func.func @transform_8(%arg0: i32) -> (i32, i32) {
    %c0_i32 = arith.constant 0 : i32
    %c0_i32_0 = arith.constant 0 : i32
    %c0_i32_1 = arith.constant 0 : i32
    return %c0_i32, %c0_i32_0 : i32, i32
  }
  func.func @transform_9(%arg0: i32) -> (i32, i32) {
    %c0_i32 = arith.constant 0 : i32
    %c0_i32_0 = arith.constant 0 : i32
    %c0_i32_1 = arith.constant 0 : i32
    return %c0_i32, %c0_i32_0 : i32, i32
  }
  func.func @transform_10(%arg0: i32) -> (i32, i32) {
    %c0_i32 = arith.constant 0 : i32
    %c0_i32_0 = arith.constant 0 : i32
    %c0_i32_1 = arith.constant 0 : i32
    return %c0_i32, %c0_i32_0 : i32, i32
  }
  func.func @transform_11(%arg0: i32) -> (i32, i32) {
    %c0_i32 = arith.constant 0 : i32
    %c0_i32_0 = arith.constant 0 : i32
    %c0_i32_1 = arith.constant 0 : i32
    return %c0_i32, %c0_i32_0 : i32, i32
  }
  func.func @transform_12(%arg0: i32) -> (i32, i32) {
    %c0_i32 = arith.constant 0 : i32
    %c0_i32_0 = arith.constant 0 : i32
    %c0_i32_1 = arith.constant 0 : i32
    return %c0_i32, %c0_i32_0 : i32, i32
  }
  func.func @transform_13(%arg0: i32) -> (i32, i32) {
    %c0_i32 = arith.constant 0 : i32
    %c0_i32_0 = arith.constant 0 : i32
    %c0_i32_1 = arith.constant 0 : i32
    return %c0_i32, %c0_i32_0 : i32, i32
  }
  func.func @transform_14(%arg0: i32) -> (i32, i32) {
    %c0_i32 = arith.constant 0 : i32
    %c0_i32_0 = arith.constant 0 : i32
    %c0_i32_1 = arith.constant 0 : i32
    return %c0_i32, %c0_i32_0 : i32, i32
  }
  func.func @transform_15(%arg0: i32) -> (i32, i32) {
    %c0_i32 = arith.constant 0 : i32
    %c0_i32_0 = arith.constant 0 : i32
    %c0_i32_1 = arith.constant 0 : i32
    return %c0_i32, %c0_i32_0 : i32, i32
  }
  func.func @transform_16(%arg0: i32) -> (i32, i32) {
    %c0_i32 = arith.constant 0 : i32
    %c0_i32_0 = arith.constant 0 : i32
    return %arg0, %c0_i32 : i32, i32
  }
}

</mosaic_0001>

<bundles_post_ra>
// kernel: tpu_custom_call.1
= control target key start
LH: loop header
LB: loop body
LE: loop exit
PB: predicated region body
PF: predicated region fallthrough
CT: control target
= control target key end

     0   :  { %s2380_s0 = inlined_call_operand.hbm [shape: bf16[16,160], index: 0, kind: input, shape index: {}]   ;;  %s2381_s1 = inlined_call_operand.vmem [shape: bf16[128,64], index: 1, kind: input, shape index: {}]   ;;  %s2382_s2 = inlined_call_operand.hbm [shape: f32[1,64], index: 2, kind: input, shape index: {}]   ;;  %s2383_s3 = inlined_call_operand.vmem [shape: bf16[64,64], index: 3, kind: input, shape index: {}]   ;;  %s2384_s4 = inlined_call_operand.hbm [shape: f32[1,64], index: 4, kind: input, shape index: {}]   ;;  %s2385_s5 = inlined_call_operand.hbm [shape: bf16[32,32], index: 5, kind: input, shape index: {}]   ;;  %s2386_s6 = inlined_call_operand.hbm [shape: f32[1,32], index: 6, kind: input, shape index: {}]   ;;  %s2387_s7 = inlined_call_operand.vmem [shape: bf16[64,64], index: 7, kind: input, shape index: {}]   ;;  %s2388_s8 = inlined_call_operand.vmem [shape: bf16[32,64], index: 8, kind: input, shape index: {}]   ;;  %s2389_s9 = inlined_call_operand.vmem [shape: f32[1,64], index: 9, kind: input, shape index: {}]   ;;  %s2390_s10 = inlined_call_operand.vmem [shape: bf16[64,64], index: 10, kind: input, shape index: {}]   ;;  %s2391_s11 = inlined_call_operand.vmem [shape: f32[1,64], index: 11, kind: input, shape index: {}]   ;;  %s2392_s12 = inlined_call_operand.hbm [shape: bf16[64,128], index: 12, kind: input, shape index: {}]   ;;  %s2393_s13 = inlined_call_operand.vmem [shape: f32[1,128], index: 13, kind: input, shape index: {}]   ;;  %s2394_s14 = inlined_call_operand.vmem [shape: f32[1,32], index: 14, kind: input, shape index: {}]   ;;  %s2395_s15 = inlined_call_operand.<no memory space> [shape: f32[1,1], index: 15, kind: input, shape index: {}]   ;;  %s2396_s16 = inlined_call_operand.hbm [shape: f32[16,128], index: 16, kind: output, shape index: {}]  }
   0x1   :  { %2409 = sst [smem:[#allocation24_spill]] %s2380_s0  ;;  %v21_v0 = vstv %s2395_s15 }
   0x2   :  { %2410 = sst [smem:[#allocation25_spill]] %s2382_s2  ;;  %22 = vst [vmem:[#allocation2] sm:$0x1] %v21_v0 }
   0x3   :  { %2411 = sst [smem:[#allocation26_spill]] %s2384_s4 }
   0x4   :  { %2412 = sst [smem:[#allocation27_spill]] %s2385_s5 }
   0x5   :  { %2413 = sst [smem:[#allocation28_spill]] %s2386_s6 }
   0x6   :  { %2414 = sst [smem:[#allocation29_spill]] %s2392_s12 }
   0x7   :  { %2415 = sst [smem:[#allocation30_spill]] %s2396_s16 }
   0x8   :  { %23 = vsyncpa [#allocation4], 0 }
   0x9   :  { %25 = vsyncpa [#allocation4 + $0x1], 0 }
   0xa   :  { %26 = vsyncpa [#allocation7], 0 }
   0xb   :  { %27 = vsyncpa [#allocation10], 0 }
   0xc   :  { %28 = vsyncpa [#allocation13], 0 }
   0xd   :  { %29 = vsyncpa [#allocation5], 0 }
   0xe   :  { %31 = vsyncpa [#allocation5 + $0x1], 0  ;;  %s2024_s23 = smov 0   ;;  %s2026_s24 = smov 0  }
   0xf   :  { %s2028_s25 = smov 0   ;;  %s2030_s26 = smov 0  }
  0x10 LB: > { %2416 = sst [smem:[#allocation20_spill]] %s1918_s25  ;;  %s1924_s15 = smov [#allocation6]   ;;  %s1922_s26 = sphi %s2030_s26, %s2449_s26   ;;  %s1918_s25 = sphi %s2028_s25, %s2451_s25   ;;  %s1914_s24 = sphi %s2026_s24, %s2453_s24   ;;  %s1910_s23 = sphi %s2024_s23, %s2452_s23  }
  0x11   : > { %2417 = sst [smem:[#allocation21_spill]] %s1922_s26  ;;  %s425_s27 = sshll.u32 %s1924_s15, 4  ;;  %s426_s27 = int_to_ptr.vmem [resolvable:$true] %s425_s27 }
  0x12   : > { %s2045_s28 = sadd.s32 4294967295, %s1922_s26   ;;  %p1358_p0 = scmp.ge.s32.totalorder %s1922_s26, 1 }
  0x13   : > { %p2401_p1 = scmp.eq.s32.totalorder %s2045_s28, 0  ;;  %p409_p2 = scmp.lt.s32.totalorder %s1922_s26, 3 }
  0x14   : > { %s1925_s30 = smov [#allocation9]   ;;  %s1926_s18 = smov [#allocation8]  }
  0x15   : > { %p2050_p3 = pnand %p1358_p0, %p409_p2  ;;  %s449_s0 = sshll.u32 %s1925_s30, 4  ;;  %s2057_s0 = int_to_ptr.vmem [resolvable:$true] %s449_s0 }
  0x16   : > { %s439_s19 = sshll.u32 %s1926_s18, 4  ;;  %s1699_s21 = scalar_lea.vmem %s426_s27, 16  ;;  %s2065_s19 = int_to_ptr.vmem [resolvable:$true] %s439_s19 }
  0x17   : > { %s2418_s29 = scalar_select %p2050_p3, 1, 0 }
  0x18   : > { %p1567_p5 = pneg %p2050_p3  ;;  %p1700_p8 = scmp.ne.s32.totalorder %s426_s27, %s1699_s21 }
  0x19   : > { %s1706_s22 = scalar_lea.vmem %s426_s27, 32  ;;  %p1707_p11 = scmp.lt.s32.totalorder %s426_s27, %s426_s27 }
  0x1a   : > { %p2061_p6 = pnand %p1567_p5, %p2401_p1  ;;  %p1708_p12 = scmp.lt.s32.totalorder %s1706_s22, %s1699_s21 }
  0x1c   : > { %p2069_p7 = pneg %p2061_p6  ;;  %p1709_p13 = por %p1708_p12, %p1707_p11 }
  0x1e   : > { %p1702_p9 = pnand %p1700_p8, %p2069_p7 }
  0x20   : > { %p1703_p10 = pneg %p1702_p9 }
  0x22   : > { %p1710_p0 = pnand %p1709_p13, %p1703_p10 }
  0x24   : > { %1713 = shalt.err (!%p1710_p0)
}
  0x25   : > { %s2421_s2 = sld [smem:[#allocation25_spill]]  ;;  %s1725_s18 = scalar_lea.vmem %s2057_s0, 256 }
  0x26   : > { %p1726_p2 = scmp.ne.s32.totalorder %s2057_s0, %s1725_s18  ;;  %p1733_p9 = scmp.lt.s32.totalorder %s2057_s0, %s2057_s0 }
  0x27   : > { %p1734_p11 = scmp.lt.s32.totalorder %s1725_s18, %s1725_s18 }
  0x28   : > { %p1728_p5 = pnand %p1726_p2, %p2069_p7 }
  0x29   : > { %p1735_p10 = por %p1734_p11, %p1733_p9 }
  0x2a   : > { %p1729_p8 = pneg %p1728_p5 }
  0x2b   : > { %1570 = dma.hbm_to_vmem [thread:$0]  (!%p2061_p6), %s2421_s2, 16, %s426_s27, [#allocation7]  }
  0x2c   : > { %p1736_p12 = pnand %p1735_p10, %p1729_p8 }
  0x2e   : > { %1739 = shalt.err (!%p1736_p12)
}
  0x2f   : > { %s2399_s21 = smov 64   ;;  %s2400_s27 = smov 4  }
  0x30   : > { %s2422_s5 = sld [smem:[#allocation27_spill]]  ;;  %s1751_s30 = scalar_lea.vmem %s2065_s19, 16 }
  0x31   : > { %p1752_p13 = scmp.ne.s32.totalorder %s2065_s19, %s1751_s30  ;;  %s1758_s18 = scalar_lea.vmem %s2065_s19, 32 }
  0x32   : > { %p1759_p5 = scmp.lt.s32.totalorder %s2065_s19, %s2065_s19  ;;  %p1760_p8 = scmp.lt.s32.totalorder %s1758_s18, %s1751_s30 }
  0x33   : > { %p1754_p0 = pnand %p1752_p13, %p2069_p7 }
  0x34   : > { %p1761_p9 = por %p1760_p8, %p1759_p5 }
  0x35   : > { %p1755_p2 = pneg %p1754_p0 }
  0x36   : > { %1576 = dma.hbm_to_vmem [thread:$0]  (!%p2061_p6), %s2422_s5, 256, %s2057_s0, [#allocation10], %s2399_s21, %s2399_s21, %s2400_s27  }
  0x37   : > { %p1762_p11 = pnand %p1761_p9, %p1755_p2 }
  0x39   : > { %1765 = shalt.err (!%p1762_p11)
}
  0x3a   : > { %s2423_s4 = sld [smem:[#allocation26_spill]]  ;;  %s1929_s0 = smov [#allocation11]  }
  0x3b   : > { %s463_s22 = sshll.u32 %s1929_s0, 4  ;;  %s1930_s15 = smov [#allocation12]   ;;  %s464_s22 = int_to_ptr.vmem [resolvable:$true] %s463_s22 }
  0x3c   : > { %s488_s21 = sshll.u32 %s1930_s15, 4  ;;  %s1777_s27 = scalar_lea.vmem %s464_s22, 16  ;;  %s489_s21 = int_to_ptr.vmem [resolvable:$true] %s488_s21 }
  0x3d   : > { %p1778_p10 = scmp.ne.s32.totalorder %s464_s22, %s1777_s27  ;;  %s1784_s30 = scalar_lea.vmem %s464_s22, 32 }
  0x3e   : > { %p1785_p0 = scmp.lt.s32.totalorder %s464_s22, %s464_s22  ;;  %p1786_p2 = scmp.lt.s32.totalorder %s1784_s30, %s1777_s27 }
  0x3f   : > { %p1780_p12 = pnand %p1778_p10, %p2069_p7 }
  0x40   : > { %1573 = dma.hbm_to_vmem [thread:$0]  (!%p2061_p6), %s2423_s4, 16, %s2065_s19, [#allocation7]  }
  0x41   : > { %p1781_p13 = pneg %p1780_p12  ;;  %p1787_p5 = por %p1786_p2, %p1785_p0 }
  0x43   : > { %p1788_p8 = pnand %p1787_p5, %p1781_p13 }
  0x45   : > { %1791 = shalt.err (!%p1788_p8)
}
  0x46   : > { %s2424_s6 = sld [smem:[#allocation28_spill]]  ;;  %s1803_s19 = scalar_lea.vmem %s489_s21, 512 }
  0x47   : > { %p1804_p9 = scmp.ne.s32.totalorder %s489_s21, %s1803_s19  ;;  %p1811_p12 = scmp.lt.s32.totalorder %s489_s21, %s489_s21 }
  0x48   : > { %p1812_p4 = scmp.lt.s32.totalorder %s1803_s19, %s1803_s19 }
  0x49   : > { %p1806_p11 = pnand %p1804_p9, %p2069_p7 }
  0x4a   : > { %p1813_p1 = por %p1812_p4, %p1811_p12 }
  0x4b   : > { %p1807_p10 = pneg %p1806_p11 }
  0x4c   : > { %1579 = dma.hbm_to_vmem [thread:$0]  (!%p2061_p6), %s2424_s6, 16, %s464_s22, [#allocation10]  }
  0x4d   : > { %p1814_p3 = pnand %p1813_p1, %p1807_p10 }
  0x4f   : > { %1817 = shalt.err (!%p1814_p3)
}
  0x50   : > { %s2425_s27 = smov 4   ;;  %s2426_s18 = smov 64  }
  0x51   : > { %s2427_s12 = sld [smem:[#allocation29_spill]]  ;;  %s1357_s17 = sadd.s32 4294967294, %s1922_s26  }
  0x52   : > { %s2127_s20 = sadd.s32 1, %s1922_s26   ;;  %s44_s22 = sadd.s32 1, %s1918_s25 }
  0x53   : > { %2428 = sst [smem:[#allocation22_spill]] %s2127_s20  ;;  %s41_s30 = ssub.s32 %s1922_s26, %s2127_s20 }
  0x54   : > { %p51_p1 = scmp.ne.s32.totalorder %s1918_s25, %s1914_s24  ;;  %p42_p3 = scmp.eq.s32.totalorder %s41_s30, 0 }
  0x55   : > { %p52_p4 = scmp.eq.s32.totalorder %s1922_s26, 0  ;;  %p57_p7 = scmp.ne.s32.totalorder %s1914_s24, %s1910_s23 }
  0x56   : > { %p396_p13 = scmp.eq.s32.totalorder %s2045_s28, 1  ;;  %p2430_p2 = scmp.eq.s32.totalorder %s2045_s28, 0 }
  0x57   : > { %1582 = dma.hbm_to_vmem [thread:$0]  (!%p2061_p6), %s2427_s12, 512, %s489_s21, [#allocation13], %s2426_s18, %s2426_s18, %s2425_s27  }
  0x58   : > { %s2139_s2 = scalar_select %p42_p3, %s1918_s25, %s44_s22  }
  0x59   : > { %p53_p0 = por %p52_p4, %p51_p1  ;;  %p2143_p5 = por %p2430_p2, %p57_p7 }
  0x5a   : > { %2429 = sst [smem:[#allocation23_spill]] %s2139_s2  ;;  %p2147_p6 = por %p396_p13, %p51_p1 }
  0x5b   : > { %s2431_s16 = scalar_select %p2143_p5, 1, 0 }
  0x5c   : > { %s2432_s21 = scalar_select %p2147_p6, 1, 0 }
  0x5d   : > { %p402_p8 = scmp.eq.s32.totalorder %s1357_s17, 1  ;;  %p1596_p9 = scmp.lt.s32.totalorder %s1922_s26, 2 }
  0x5e   : > { %s511_s19 = sand.u32 1, %s1918_s25   ;;  %s1423_s0 = sshll.u32 %s1922_s26, 7 }
  0x5f   : > { %p2153_p11 = por %p402_p8, %p57_p7  ;;  %s1365_s18 = sshll.u32 %s511_s19, 3 }
  0x60   : > { %s2434_s30 = sld [smem:[#allocation24_spill]]  ;;  %s515_s5 = scalar_lea.vmem [#allocation3], %s1365_s18 }
  0x61   : > { %s2433_s27 = scalar_select %p2153_p11, 1, 0 }
  0x62   : > { %s523_s6 = sshll.u32 %s515_s5, 4  ;;  %p2163_p10 = pnand %p1596_p9, %p53_p0  ;;  %s524_s6 = int_to_ptr.vmem [resolvable:$true] %s523_s6 }
  0x63   : > { %s512_s12 = scalar_lea.sflag [#allocation4], %s511_s19 }
  0x64   : > { %p1820_p1 = pneg %p2163_p10 }
  0x66   : > { %s2161_s4 = scalar_lea.hbm %s2434_s30, %s1423_s0  ;;  %s1823_s22 = scalar_lea.hbm %s2434_s30, 256 }
  0x67   : > { %s1818_s2 = scalar_lea.hbm %s2161_s4, 128  ;;  %p1824_p7 = scmp.lt.s32.totalorder %s2161_s4, %s2434_s30 }
  0x68   : > { %p1819_p12 = scmp.ne.s32.totalorder %s2161_s4, %s1818_s2  ;;  %p1825_p13 = scmp.lt.s32.totalorder %s1823_s22, %s1818_s2 }
  0x6a   : > { %p1821_p3 = pnand %p1820_p1, %p1819_p12  ;;  %p1826_p0 = por %p1825_p13, %p1824_p7 }
  0x6c   : > { %p1822_p4 = pneg %p1821_p3 }
  0x6e   : > { %p1827_p2 = pnand %p1826_p0, %p1822_p4 }
  0x70   : > { %1830 = shalt.err (!%p1827_p2)
}
  0x71   : > { %s1831_s5 = scalar_lea.vmem %s524_s6, 128  ;;  %s1931_s19 = smov [#allocation3]  }
  0x72   : > { %p1832_p8 = scmp.ne.s32.totalorder %s524_s6, %s1831_s5  ;;  %s1836_s20 = sshll.u32 %s1931_s19, 4  ;;  %s1837_s20 = int_to_ptr.vmem [resolvable:$false] %s1836_s20 }
  0x73   : > { %s1838_s26 = scalar_lea.vmem %s1837_s20, 256  ;;  %p1839_p12 = scmp.lt.s32.totalorder %s524_s6, %s1837_s20 }
  0x74   : > { %p1834_p9 = pnand %p1832_p8, %p1820_p1  ;;  %p1840_p3 = scmp.lt.s32.totalorder %s1838_s26, %s1831_s5 }
  0x76   : > { %p1835_p11 = pneg %p1834_p9  ;;  %p1841_p6 = por %p1840_p3, %p1839_p12 }
  0x78   : > { %p1842_p5 = pnand %p1841_p6, %p1835_p11 }
  0x7a   : > { %1845 = shalt.err (!%p1842_p5)
}
  0x7b   : > { %1586 = dma.hbm_to_vmem [thread:$0]  (!%p2163_p10), %s2161_s4, 128, %s524_s6, %s512_s12  }
  0x7c   : > { %p2436_p4 = scmp.ne.s32.totalorder %s2418_s29, 0 }
  0x7d   : > { %s2184_s25 = sand.u32 (!%p2436_p4), 1, %s1914_s24   ;;  %p2437_p5 = scmp.ne.s32.totalorder (!%p2436_p4), %s2431_s16, 0 }
  0x7e   : > { %532 = sbr.rel (%p2436_p4) target bundleno = 1554 (0x612), region = 84  ;;  %s1369_s2 = sshll.u32 (!%p2436_p4), %s2184_s25, 3 }
  0x7f   : > { %s535_s20 = scalar_lea.sflag (!%p2436_p4), [#allocation4], %s2184_s25  ;;  %s2190_s26 = scalar_lea.vmem (!%p2436_p4), [#allocation3], %s1369_s2 }
  0x83   : > { %1889 = dma.done.wait (%p2437_p5), %s535_s20, 128  }
  0x84   : > { %1891 = vsyncadd (%p2437_p5), %s535_s20, 4294967168  ;;  %p2438_p6 = scmp.eq.s32.totalorder %s2045_s28, 0 }
  0x86   : > { %1893 = dma.done.wait (%p2438_p6), [#allocation7], 32   ;;  %p2439_p11 = pmov %p2438_p6 }
  0x87   : > { %p2440_p10 = pmov %p2438_p6 }
  0x88   : > { %1895 = vsyncadd (%p2439_p11), [#allocation7], 4294967264 }
  0x89   : > { %1897 = dma.done.wait (%p2440_p10), [#allocation10], 272   ;;  %p2441_p1 = pmov %p2438_p6 }
  0x8b   : > { %1899 = vsyncadd (%p2441_p1), [#allocation10], 4294967024  ;;  %p2442_p7 = pmov %p2441_p1 }
  0x8c   : > { %p2443_p13 = pmov %p2441_p1 }
  0x8d   : > { %1901 = dma.done.wait (%p2442_p7), [#allocation13], 512  }
  0x8e   : > { %1903 = vsyncadd (%p2443_p13), [#allocation13], 4294966784  ;;  %v1932_v1 = vmov 0.0   ;;  %vm1933_vm0 = vmmov 0   ;;  %v1646_v2 = vld [vmem:[%s2381_s1 + $0x38] sm:$0xff]   ;;  %v1647_v3 = vld [vmem:[%s2381_s1 + $0x30] sm:$0xff]  }
  0x8f   : > { %1459 = vmatprep.subr.bf16.mxu0 %v1932_v1  ;;  %1475 = vmatprep.mubr.msk.bf16.mxu0 %vm1933_vm0, %v1932_v1  ;;  %v1648_v4 = vld [vmem:[%s2381_s1 + $0x28] sm:$0xff]   ;;  %v1649_v5 = vld [vmem:[%s2381_s1 + $0x20] sm:$0xff]   ;;  %v1650_v6 = vld [vmem:[%s2381_s1 + $0x18] sm:$0xff]   ;;  %vm913_vm1 = vcmask 261120   ;;  %vm761_vm2 = vcmask 523264   ;;  %s606_s19 = scalar_lea.vmem [#allocation14], %s1369_s2 }
  0x90   : > { %1479 = vmatprep.subr.bf16.mxu1 %v1932_v1  ;;  %1487 = vmatprep.mubr.msk.bf16.mxu1 %vm1933_vm0, %v1932_v1  ;;  %v1651_v7 = vld [vmem:[%s2381_s1 + $0x10] sm:$0xff]   ;;  %v1652_v8 = vld [vmem:[%s2381_s1 + $0x8] sm:$0xff]   ;;  %v1653_v9 = vld [vmem:[%s2381_s1] sm:$0xff]   ;;  %s1239_s20 = sshll.u32 %s606_s19, 4  ;;  %s2444_s12 = sld [smem:[#allocation30_spill]]  ;;  %s1240_s20 = int_to_ptr.vmem [resolvable:$true] %s1239_s20 }
  0x91   : > { %1460 = vmatpush3.bf16.msra.mxu0 %v1646_v2  ;;  %v608_v10 = vld [vmem:[%s2190_s26] sm:$0xf]  ;;  %v1654_v11 = vld [vmem:[%s2383_s3 + $0x18] sm:$0xff]   ;;  %v1655_v12 = vld [vmem:[%s2383_s3 + $0x10] sm:$0xff]   ;;  %s1226_s16 = scalar_lea.sflag [#allocation5], %s2184_s25  ;;  %s1846_s17 = scalar_lea.vmem %s1240_s20, 128 }
  0x92   : > { %1461 = vmatprep.subr.bf16.mxu0 %v1932_v1  ;;  %1480 = vmatpush3.bf16.msra.mxu1 %v1654_v11  ;;  %v1656_v13 = vld [vmem:[%s2383_s3 + $0x8] sm:$0xff]   ;;  %v1657_v14 = vld [vmem:[%s2383_s3] sm:$0xff]   ;;  %v1659_v16 = vld [vmem:[#allocation9] sm:$0xff]   ;;  %p1847_p0 = scmp.ne.s32.totalorder %s1240_s20, %s1846_s17  ;;  %p2445_p2 = scmp.ne.s32.totalorder %s2432_s21, 0 }
  0x93   : > { %1481 = vmatprep.subr.bf16.mxu1 %v1932_v1  ;;  %v1658_v15 = vld [vmem:[#allocation9 + $0x8] sm:$0xff]   ;;  %v889_v17 = vld [vmem:[%s2190_s26 + $0x4] sm:$0xf]  ;;  %v1376_v18 = vld [vmem:[#allocation6] ss:$0 sm:$0xff]  ;;  %s1420_s26 = sshll.u32 %s2045_s28, 7 }
  0x94   : > { %v1660_v26 = vld [vmem:[%s2387_s7 + $0x18] sm:$0xff]   ;;  %v1661_v27 = vld [vmem:[%s2387_s7 + $0x10] sm:$0xff]   ;;  %v1662_v28 = vld [vmem:[%s2387_s7 + $0x8] sm:$0xff]   ;;  %p1848_p8 = pnand %p1847_p0, %p2445_p2  ;;  %s1935_s28 = smov [#allocation14]  }
  0x95   : > { %1462 = vmatpush3.bf16.msra.mxu0 %v1647_v3  ;;  %v1663_v30 = vld [vmem:[%s2387_s7] sm:$0xff]   ;;  %v1385_v34 = vld [vmem:[#allocation8] ss:$0 sm:$0xff]  ;;  %v1664_v43 = vld [vmem:[%s2388_s8 + $0x8] sm:$0xff]   ;;  %s1850_s0 = sshll.u32 %s1935_s28, 4  ;;  %s1851_s0 = int_to_ptr.vmem [resolvable:$false] %s1850_s0 }
  0x96   : > { %1463 = vmatprep.subr.bf16.mxu0 %v1932_v1  ;;  %1482 = vmatpush3.bf16.msra.mxu1 %v1655_v12  ;;  %v1397_v40 = vld [vmem:[#allocation11] ss:$0 sm:$0xff]  ;;  %v1666_v48 = vld [vmem:[%s2390_s10 + $0x18] sm:$0xff]   ;;  %v1667_v49 = vld [vmem:[%s2390_s10 + $0x10] sm:$0xff]   ;;  %s2343_s29 = scalar_lea.hbm %s2444_s12, %s1420_s26  ;;  %p1849_p9 = pneg %p1848_p8 }
  0x97   : > { %1483 = vmatprep.subr.bf16.mxu1 %v1932_v1  ;;  %v1665_v46 = vld [vmem:[%s2388_s8] sm:$0xff]   ;;  %v1668_v50 = vld [vmem:[%s2390_s10 + $0x8] sm:$0xff]   ;;  %v1671_v3 = vld [vmem:[#allocation12 + $0x10] sm:$0xff]   ;;  %s1852_s2 = scalar_lea.vmem %s1851_s0, 256  ;;  %p1853_p12 = scmp.lt.s32.totalorder %s1240_s20, %s1851_s0 }
  0x98   : > { %v1669_v51 = vld [vmem:[%s2390_s10] sm:$0xff]   ;;  %p1854_p3 = scmp.lt.s32.totalorder %s1852_s2, %s1846_s17 }
  0x99   : > { %1464 = vmatpush3.bf16.msra.mxu0 %v1648_v4  ;;  %v1391_v54 = vld [vmem:[%s2389_s9] ss:$0 sm:$0xff]  ;;  %v1672_v4 = vld [vmem:[#allocation12 + $0x8] sm:$0xff]  }
  0x9a   : > { %1465 = vmatprep.subr.bf16.mxu0 %v1932_v1  ;;  %1484 = vmatpush3.bf16.msra.mxu1 %v1656_v13  ;;  %v1670_v2 = vld [vmem:[#allocation12 + $0x18] sm:$0xff]   ;;  %p1855_p4 = por %p1854_p3, %p1853_p12 }
  0x9b   : > { %1485 = vmatprep.subr.bf16.mxu1 %v1932_v1 }
  0x9c   : > { %p1856_p5 = pnand %p1855_p4, %p1849_p9 }
  0x9d   : > { %1466 = vmatpush3.bf16.msra.mxu0 %v1649_v5  ;;  %v1673_v5 = vld [vmem:[#allocation12] sm:$0xff]  }
  0x9e   : > { %1467 = vmatprep.subr.bf16.mxu0 %v1932_v1  ;;  %1486 = vmatpush3.bf16.msra.mxu1 %v1657_v14 }
  0x9f   : > { %1491 = vmatprep.subr.bf16.mxu1 %v1932_v1 }
  0xa1   : > { %1468 = vmatpush3.bf16.msra.mxu0 %v1650_v6  ;;  %v1404_v6 = vld [vmem:[%s2391_s11] ss:$0 sm:$0xff] }
  0xa2   : > { %1469 = vmatprep.subr.bf16.mxu0 %v1932_v1 }
  0xa5   : > { %1470 = vmatpush3.bf16.msra.mxu0 %v1651_v7 }
  0xa6   : > { %1471 = vmatprep.subr.bf16.mxu0 %v1932_v1 }
  0xa9   : > { %1472 = vmatpush3.bf16.msra.mxu0 %v1652_v8 }
  0xaa   : > { %1473 = vmatprep.subr.bf16.mxu0 %v1932_v1 }
  0xad   : > { %1474 = vmatpush3.bf16.msra.mxu0 %v1653_v9 }
  0xae   : > { %1503 = vmatprep.subr.bf16.mxu0 %v1932_v1 }
  0xb0   : > { %1476 = vmatmul.mubr.bf16.vlgmr.msra.gmra.mxu0 %v608_v10 }
  0xb1   : > { %1507 = vmatprep.mubr.msk.bf16.mxu0 %vm1933_vm0, %v1932_v1  ;;  %1504 = vmatpush3.bf16.msra.mxu0 %v1658_v15 }
  0xb2   : > { %1505 = vmatprep.subr.bf16.mxu0 %v1932_v1 }
  0xb5   : > { %1506 = vmatpush3.bf16.msra.mxu0 %v1659_v16 }
  0xb6   : > { %1519 = vmatprep.subr.bf16.mxu0 %v1932_v1 }
  0xb8   : > { %1508 = vmatmul.mubr.msk.bf16.vlgmr.msra.gmra.mxu0 %vm913_vm1, %v889_v17 }
  0xb9   : > { %1527 = vmatprep.mubr.msk.bf16.mxu0 %vm1933_vm0, %v1932_v1  ;;  %1520 = vmatpush3.bf16.msra.mxu0 %v1666_v48 }
  0xba   : > { %1521 = vmatprep.subr.bf16.mxu0 %v1932_v1 }
  0xbd   : > { %1522 = vmatpush3.bf16.msra.mxu0 %v1667_v49 }
  0xbe   : > { %1523 = vmatprep.subr.bf16.mxu0 %v1932_v1 }
  0xc1   : > { %1524 = vmatpush3.bf16.msra.mxu0 %v1668_v50 }
  0xc2   : > { %1525 = vmatprep.subr.bf16.mxu0 %v1932_v1 }
  0xc5   : > { %1526 = vmatpush3.bf16.msra.mxu0 %v1669_v51 }
 0x170   : > { %v714_v19 = vpop.f32.mrf.mxu0 }
 0x171   : > { %v715_v20 = vadd.f32 %v1376_v18, %v714_v19  ;;  %v1416_v19 = vld [vmem:[%s2394_s14] ss:$0 sm:$0xff] }
 0x172   : > { %v1477_v21 = vpop.f32.mrf.mxu0 }
 0x173   : > { %1674 = vtanh.f32 %v715_v20 }
 0x174   : > { %v717_v22 = vpop.f32.mrf.mxu0 }
 0x176   : > { %v1478_v23 = vpop.f32.mrf.mxu0 }
 0x177   : > { %v1934_v23 = vmov 0  }
 0x178   : > { %v951_v29 = vpop.f32.mrf.mxu0  ;;  %1645 = vset.pattern.permute.xlu0 %v1934_v23 }
 0x179   : > { %v952_v41 = vadd.f32 %v1397_v40, %v951_v29 }
 0x17a   : > { %v1509_v31 = vpop.f32.mrf.mxu0 }
 0x17b   : > { %v957_v45 = vmax.f32 %v952_v41, 0.0 }
 0x17c   : > { %v954_v32 = vpop.f32.mrf.mxu0 }
 0x17d   : > { %v958_v47 = vpack.c.bf16 %v957_v45, %v957_v45 }
 0x17e   : > { %v1510_v33 = vpop.f32.mrf.mxu0 }
 0x17f   : > { %v1215_v33 = vlaneseq }
 0x180   : > { %v1675_v24 = vpop.eup %1674 }
 0x181   : > { %v721_v25 = vpack.c.bf16 %v1675_v24, %v1675_v24  ;;  %v1417_v24 = vld [vmem:[#allocation2] ss:$0 sm:$0xff] }
 0x183   : > { %1488 = vmatmul.mubr.msk.bf16.vlgmr.msra.gmra.mxu1 %vm761_vm2, %v721_v25 }
 0x184   : > { %1499 = vmatprep.mubr.msk.bf16.mxu1 %vm1933_vm0, %v1932_v1  ;;  %1492 = vmatpush3.bf16.msra.mxu1 %v1660_v26 }
 0x185   : > { %1493 = vmatprep.subr.bf16.mxu1 %v1932_v1 }
 0x188   : > { %1494 = vmatpush3.bf16.msra.mxu1 %v1661_v27 }
 0x189   : > { %1495 = vmatprep.subr.bf16.mxu1 %v1932_v1 }
 0x18c   : > { %1496 = vmatpush3.bf16.msra.mxu1 %v1662_v28 }
 0x18d   : > { %1497 = vmatprep.subr.bf16.mxu1 %v1932_v1 }
 0x190   : > { %1498 = vmatpush3.bf16.msra.mxu1 %v1663_v30 }
 0x191   : > { %1511 = vmatprep.subr.bf16.mxu1 %v1932_v1 }
 0x243   : > { %v799_v35 = vpop.f32.mrf.mxu1 }
 0x244   : > { %v800_v36 = vadd.f32 %v1385_v34, %v799_v35  ;;  %v1216_v34 = vand.u32 127, %v1215_v33 }
 0x245   : > { %v1489_v37 = vpop.f32.mrf.mxu1 }
 0x246   : > { %1676 = vtanh.f32 %v800_v36  ;;  %vm1217_vm3 = vcmp.eq.s32.totalorder %v1216_v34, 35 }
 0x247   : > { %v802_v38 = vpop.f32.mrf.mxu1 }
 0x249   : > { %v1490_v39 = vpop.f32.mrf.mxu1 }
 0x253   : > { %v1677_v42 = vpop.eup %1676 }
 0x254   : > { %v806_v44 = vpack.c.bf16 %v1677_v42, %v1677_v42 }
 0x256   : > { %1500 = vmatmul.mubr.msk.bf16.vlgmr.msra.gmra.mxu1 %vm761_vm2, %v806_v44 }
 0x257   : > { %1512 = vmatpush3.bf16.msra.mxu1 %v1664_v43  ;;  %1515 = vmatprep.mubr.msk.bf16.mxu1 %vm1933_vm0, %v1932_v1 }
 0x258   : > { %1513 = vmatprep.subr.bf16.mxu1 %v1932_v1 }
 0x25b   : > { %1514 = vmatpush3.bf16.msra.mxu1 %v1665_v46 }
 0x25c   : > { %1531 = vmatprep.subr.bf16.mxu1 %v1932_v1 }
 0x25e   : > { %1516 = vmatmul.mubr.msk.bf16.vlgmr.msra.gmra.mxu1 %vm913_vm1, %v958_v47 }
 0x25f   : > { %1539 = vmatprep.mubr.msk.bf16.mxu1 %vm1933_vm0, %v1932_v1  ;;  %1532 = vmatpush3.bf16.msra.mxu1 %v1670_v2 }
 0x260   : > { %1533 = vmatprep.subr.bf16.mxu1 %v1932_v1 }
 0x263   : > { %1534 = vmatpush3.bf16.msra.mxu1 %v1671_v3 }
 0x264   : > { %1535 = vmatprep.subr.bf16.mxu1 %v1932_v1 }
 0x267   : > { %1536 = vmatpush3.bf16.msra.mxu1 %v1672_v4 }
 0x268   : > { %1537 = vmatprep.subr.bf16.mxu1 %v1932_v1  ;;  %v1410_v1 = vld [vmem:[%s2393_s13] ss:$0 sm:$0xff] }
 0x26b   : > { %1538 = vmatpush3.bf16.msra.mxu1 %v1673_v5 }
 0x316   : > { %v883_v52 = vpop.f32.mrf.mxu1 }
 0x317   : > { %v884_v57 = vadd.f32 %v1391_v54, %v883_v52 }
 0x318   : > { %v1501_v53 = vpop.f32.mrf.mxu1 }
 0x31a   : > { %v886_v55 = vpop.f32.mrf.mxu1 }
 0x31c   : > { %v1502_v56 = vpop.f32.mrf.mxu1 }
 0x31e   : > { %v1012_v58 = vpop.f32.mrf.mxu1 }
 0x31f   : > { %v1018_v59 = vadd.f32 %v1012_v58, %v884_v57 }
 0x320   : > { %v1517_v60 = vpop.f32.mrf.mxu1 }
 0x321   : > { %1678 = vtanh.f32 %v1018_v59 }
 0x322   : > { %v1015_v61 = vpop.f32.mrf.mxu1 }
 0x324   : > { %v1518_v62 = vpop.f32.mrf.mxu1 }
 0x32e   : > { %v1679_v63 = vpop.eup %1678 }
 0x32f   : > { %v1020_v0 = vpack.c.bf16 %v1679_v63, %v1679_v63 }
 0x331   : > { %1528 = vmatmul.mubr.msk.bf16.vlgmr.msra.gmra.mxu0 %vm761_vm2, %v1020_v0 }
 0x3f1   : > { %v1097_v7 = vpop.f32.mrf.mxu0 }
 0x3f2   : > { %v1098_v8 = vadd.f32 %v1404_v6, %v1097_v7 }
 0x3f3   : > { %v1529_v9 = vpop.f32.mrf.mxu0 }
 0x3f4   : > { %1680 = vtanh.f32 %v1098_v8 }
 0x3f5   : > { %v1100_v10 = vpop.f32.mrf.mxu0 }
 0x3f7   : > { %v1530_v11 = vpop.f32.mrf.mxu0 }
 0x401   : > { %v1681_v12 = vpop.eup %1680 }
 0x402   : > { %v1104_v13 = vpack.c.bf16 %v1681_v12, %v1681_v12 }
 0x404   : > { %1540 = vmatmul.mubr.msk.bf16.vlgmr.msra.gmra.mxu1 %vm761_vm2, %v1104_v13 }
 0x4c4   : > { %v1181_v14 = vpop.f32.mrf.mxu1 }
 0x4c5   : > { %v1182_v15 = vadd.f32 %v1410_v1, %v1181_v14 }
 0x4c6   : > { %v1541_v16 = vpop.f32.mrf.mxu1 }
 0x4c7   : > { %1682 = vtanh.f32 %v1182_v15 }
 0x4c8   : > { %v1184_v17 = vpop.f32.mrf.mxu1 }
 0x4ca   : > { %v1542_v18 = vpop.f32.mrf.mxu1 }
 0x4d4   : > { %v1683_v20 = vpop.eup %1682 }
 0x4d5   : > { %v1195_v21 = vmul.f32 %v1683_v20, %v1416_v19 }
 0x4d7   : > { %v1196_v22 = vsel %vm913_vm1, %v1195_v21, 0.0 }
 0x4d8   : > { %1197 = vadd.xlane.f32.xlu0 %v1196_v22 }
 0x561   : > { %v1198_v25 = vpop.xlane.xlu0 %1197 }
 0x562   : > { %v1206_v26 = vadd.f32 %v1417_v24, %v1198_v25 }
 0x564   : > { %v1418_v27 = vmul.f32 -1.442695, %v1206_v26 }
 0x566   : > { %1684 = vpow2.f32 %v1418_v27 }
 0x573   : > { %v1685_v28 = vpop.eup %1684 }
 0x574   : > { %v1210_v29 = vadd.f32 1.0, %v1685_v28 }
 0x576   : > { %1686 = vrcp.f32 %v1210_v29 }
 0x583   : > { %v1687_v30 = vpop.eup %1686 }
 0x584   : > { %v1213_v31 = vmul.f32 2.9, %v1687_v30 }
 0x586   : > { %v1214_v32 = vadd.f32 0.1, %v1213_v31 }
 0x588   : > { %1220 = vperm.xlu0 %1645, %v1214_v32  }
 0x603   : > { %v1221_v35 = vpop.permute.xlu0 %1220 }
 0x604   : > { %v1223_v36 = vsel %vm1217_vm3, %v1221_v35, %v1182_v15 }
 0x605   : > { %1224 = vst [vmem:[%s606_s19] sm:$0xff] %v1223_v36 }
 0x606   : > { %1859 = shalt.err (!%p1856_p5)
}
 0x607   : > { %s1860_s15 = scalar_lea.hbm %s2343_s29, 128  ;;  %s1864_s18 = scalar_lea.hbm %s2444_s12, 256 }
 0x608   : > { %p1861_p6 = scmp.ne.s32.totalorder %s2343_s29, %s1860_s15  ;;  %p1865_p1 = scmp.lt.s32.totalorder %s2343_s29, %s2444_s12 }
 0x609   : > { %p1866_p7 = scmp.lt.s32.totalorder %s1864_s18, %s1860_s15 }
 0x60a   : > { %p1862_p11 = pnand %p1861_p6, %p2445_p2 }
 0x60b   : > { %p1867_p13 = por %p1866_p7, %p1865_p1 }
 0x60c   : > { %p1863_p10 = pneg %p1862_p11 }
 0x60e   : > { %p1868_p0 = pnand %p1867_p13, %p1863_p10 }
 0x610   : > { %1871 = shalt.err (!%p1868_p0)
}
 0x611   : > { %1565 = dma.vmem_to_hbm [thread:$0]  (%p2445_p2), %s1240_s20, 128, %s2343_s29, %s1226_s16  }
 0x612 PF: > { %s2446_s19 = sld [smem:[#allocation21_spill]]  ;;  %s1251_s4 = sand.u32 1, %s1910_s23  }
 0x613   : > { %p2447_p8 = scmp.ne.s32.totalorder %s2433_s27, 0  ;;  %s1252_s6 = scalar_lea.sflag [#allocation5], %s1251_s4 }
 0x618   : > { %p2448_p9 = scmp.ge.s32.totalorder %s2446_s19, 2 }
 0x61a   : > { %p1588_p12 = pnand %p2448_p9, %p2447_p8 }
 0x61c   : > { %p1589_p3 = pneg %p1588_p12 }
 0x61e   : > { %1905 = dma.done.wait (%p1589_p3), %s1252_s6, 128  }
 0x61f   : > { %1907 = vsyncadd (%p1589_p3), %s1252_s6, 4294967168  ;;  %s2449_s26 = sld [smem:[#allocation22_spill]]  ;;  %s2452_s23 = smov %s1914_s24 }
 0x620   : > { %s2450_s17 = sld [smem:[#allocation20_spill]] }
 0x621   : > { %s2451_s25 = sld [smem:[#allocation23_spill]] }
 0x625   : > { %p34_p4 = scmp.ge.s32.totalorder %s2449_s26, 4  }
 0x626   : > { %s2453_s24 = smov %s2450_s17 }
 0x627   :  { %36 = sbr.rel (!%p34_p4) target bundleno = 16 (0x10), region = 149 }
 0x62c   :  { %1257 = vsyncpa [#allocation4], 1 }
 0x62d   :  { %1259 = vsyncpa [#allocation4 + $0x1], 1 }
 0x62e   :  { %1260 = vsyncpa [#allocation7], 1 }
 0x62f   :  { %1261 = vsyncpa [#allocation10], 1 }
 0x630   :  { %1262 = vsyncpa [#allocation13], 1 }
 0x631   :  { %1263 = vsyncpa [#allocation5], 1 }
 0x632   :  { %1265 = vsyncpa [#allocation5 + $0x1], 1 }

</bundles_post_ra>
